<compile_context>
chip_gen: v6e
topology: v6e:2x2x1
jax: 0.10.0
libtpu: 0.0.40
codegen_flags: <defaults>
</compile_context>

<pallas_src>
import functools

import jax
import jax.numpy as jnp
from jax.experimental import pallas as pl
from jax.experimental.pallas import tpu as pltpu


def _avgpool_bn_kernel(x_ref, p_ref, icnt_ref, o_ref, s1_ref, s2_ref,
                       *, inv_n, eps):
    """One (channel-block, batch) grid step.

    x_ref:    (c_block, H*W)      f32   one batch sample, c_block channels
    p_ref:    (H*W, Ho*Wo)        bf16  0/1 pooling band mask (pad+stride baked in)
    icnt_ref: (1, Ho*Wo)          f32   1/count divisor per output position
    o_ref:    (N, c_block, Ho*Wo) f32   resident across the batch grid axis
    s1_ref:   (c_block, 1)        f32   running per-channel sum
    s2_ref:   (c_block, 1)        f32   running per-channel sum of squares
    """
    n = pl.program_id(1)

    @pl.when(n == 0)
    def _init():
        s1_ref[...] = jnp.zeros_like(s1_ref)
        s2_ref[...] = jnp.zeros_like(s2_ref)

    # Average pool = one MXU matmul against the exact 0/1 band mask, then the
    # 1/count divisor as a cheap lane-broadcast VPU multiply (f32 throughout).
    p = p_ref[...].astype(jnp.float32)
    y = jnp.dot(x_ref[...], p, preferred_element_type=jnp.float32)
    y = y * icnt_ref[...]                                    # (c_block, Ho*Wo)

    o_ref[n, :, :] = y.astype(o_ref.dtype)

    # BatchNorm2d training statistics, accumulated across batch steps in f32.
    s1_ref[...] += jnp.sum(y, axis=1, keepdims=True)
    s2_ref[...] += jnp.sum(y * y, axis=1, keepdims=True)

    @pl.when(n == pl.num_programs(1) - 1)
    def _finalize():
        mean = s1_ref[...] * inv_n                           # (c_block, 1)
        var = s2_ref[...] * inv_n - mean * mean              # biased variance
        scale = jax.lax.rsqrt(var + eps)                     # EUP slot
        y_all = o_ref[...].astype(jnp.float32)               # (N, c_block, HoWo)
        o_ref[...] = ((y_all - mean[None, :, :]) * scale[None, :, :]
                      ).astype(o_ref.dtype)


def _pick_c_block(C, need_bytes, budget):
    cands = sorted({d for d in range(8, min(C, 256) + 1, 8) if C % d == 0},
                   reverse=True)
    if not cands:
        return C                       # tiny / non-multiple-of-8 C: full block
    for cb in cands:
        if need_bytes(cb) <= budget:
            return cb
    return cands[-1]


def avgpool2d_bn(x, kernel_size, stride, padding, count_include_pad,
                 eps=1e-5):
    """x: (N, C, H, W).  Returns BN(AvgPool2d(x)) with shape (N, C, Ho, Wo)."""
    N, C, H, W = x.shape
    K, s, p = int(kernel_size), int(stride), int(padding)
    Ho = (H + 2 * p - K) // s + 1
    Wo = (W + 2 * p - K) // s + 1
    HW, HoWo = H * W, Ho * Wo

    # ---- Banded 0/1 pooling operators; zero padding & stride baked in.
    # A_h[o, h] = 1  iff  o*s - p <= h < o*s - p + K  (h in [0, H) implicitly).
    oh = jnp.arange(Ho)[:, None]
    hh = jnp.arange(H)[None, :]
    A_h = ((hh >= oh * s - p) & (hh < oh * s - p + K)).astype(jnp.float32)
    ow = jnp.arange(Wo)[:, None]
    ww = jnp.arange(W)[None, :]
    A_w = ((ww >= ow * s - p) & (ww < ow * s - p + K)).astype(jnp.float32)

    if count_include_pad:
        counts = jnp.full((Ho, Wo), float(K * K), jnp.float32)
    else:
        counts = A_h.sum(1)[:, None] * A_w.sum(1)[None, :]   # valid elements
    inv_cnt = (1.0 / counts).reshape(1, HoWo).astype(jnp.float32)

    # P_sp[h*W + w, o*Wo + q] = A_h[o, h] * A_w[q, w]; exact 0/1 so bf16 is
    # lossless.  The divisor stays OUT of P (applied in f32 on the VPU).
    P_sp = jnp.einsum('oh,qw->hwoq', A_h, A_w).reshape(HW, HoWo)
    P_sp = P_sp.astype(jnp.bfloat16)
    # TODO(synk): when H*W x Ho*Wo alone exceeds the VMEM budget (e.g. 64x64
    # images), add a contraction-axis grid dimension over H*W with an f32
    # accumulator instead of keeping P_sp fully resident.

    # ---- Per-generation VMEM budget (v5e/v6e 128 MiB, v7x 64 MiB per core).
    vmem_cap = 64 * 1024 * 1024
    try:
        vmem_cap = int(pltpu.get_tpu_info().vmem_capacity_bytes)
    except Exception:
        pass
    budget = min(int(0.75 * vmem_cap), 100 * 1024 * 1024)

    def need_bytes(cb):
        return (2 * cb * HW * 4              # x block (double-buffered, f32)
                + 2 * N * cb * HoWo * 4      # resident output block (2 bufs)
                + 2 * HW * HoWo * 2          # bf16 P (2x in case of fallback)
                + 2 * HoWo * 4               # inv-count row
                + 2 * max(cb, 8) * 128 * 4)  # (cb, 1) f32 scratch, padded

    c_block = _pick_c_block(C, need_bytes, budget)
    # TODO(synk): with tiny C (demo C=4) the parallel channel axis has a
    # single grid step, so one v7x TensorCore idles, and a VPU K*K
    # shifted-add pool would beat the matmul in that regime.
    vmem_limit = int(min(max(4 * need_bytes(c_block), 16 * 1024 * 1024),
                         budget))

    grid = (C // c_block, N)
    x_r = x.reshape(N, C, HW)        # free reshape of NCHW (no HBM transpose)

    kernel = functools.partial(_avgpool_bn_kernel,
                               inv_n=1.0 / float(N * HoWo),
                               eps=float(eps))

    def make_call(single_buffer_p):
        if single_buffer_p:
            p_spec = pl.BlockSpec((HW, HoWo), lambda c, n: (0, 0),
                                  pipeline_mode=pl.Buffered(1))
        else:
            p_spec = pl.BlockSpec((HW, HoWo), lambda c, n: (0, 0))
        return pl.pallas_call(
            kernel,
            out_shape=jax.ShapeDtypeStruct((N, C, HoWo), x.dtype),
            grid=grid,
            in_specs=[
                pl.BlockSpec((None, c_block, HW), lambda c, n: (n, c, 0)),
                p_spec,
                pl.BlockSpec((1, HoWo), lambda c, n: (0, 0)),
            ],
            out_specs=pl.BlockSpec((N, c_block, HoWo), lambda c, n: (0, c, 0)),
            scratch_shapes=[pltpu.VMEM((c_block, 1), jnp.float32),
                            pltpu.VMEM((c_block, 1), jnp.float32)],
            compiler_params=pltpu.CompilerParams(
                dimension_semantics=("parallel", "arbitrary"),
                vmem_limit_bytes=vmem_limit),
        )

    try:
        out = jax.block_until_ready(make_call(True)(x_r, P_sp, inv_cnt))
    except Exception:
        # Fallback if this build rejects single-buffering a constant-index
        # operand: default double-buffering (already counted in the budget).
        out = jax.block_until_ready(make_call(False)(x_r, P_sp, inv_cnt))

    return out.reshape(N, C, Ho, Wo)


def _reference(x, K, stride, padding, count_include_pad, eps=1e-5):
    """Pure-JAX reference (reduce_window) for correctness checking."""
    pad = [(0, 0), (0, 0), (padding, padding), (padding, padding)]
    sums = jax.lax.reduce_window(x, 0.0, jax.lax.add, (1, 1, K, K),
                                 (1, 1, stride, stride), pad)
    if count_include_pad:
        cnt = jnp.asarray(float(K * K), x.dtype)
    else:
        cnt = jax.lax.reduce_window(jnp.ones_like(x), 0.0, jax.lax.add,
                                    (1, 1, K, K), (1, 1, stride, stride), pad)
    y = sums / cnt
    mean = jnp.mean(y, axis=(0, 2, 3), keepdims=True)
    var = jnp.mean((y - mean) ** 2, axis=(0, 2, 3), keepdims=True)
    return (y - mean) / jnp.sqrt(var + eps)


if __name__ == "__main__":
    N, C, H, W = 2, 4, 16, 16
    key = jax.random.PRNGKey(0)
    x = jax.random.normal(key, (N, C, H, W), dtype=jnp.float32)

    # (kernel, stride, padding, count_include_pad) — typical NAS avg-pool ops.
    configs = [
        (3, 1, 1, False),
        (3, 1, 1, True),
        (3, 2, 1, True),
        (2, 2, 0, False),
    ]
    for (K, s, p, cip) in configs:
        out = avgpool2d_bn(x, K, s, p, cip)
        out = jax.block_until_ready(out)
        ref = _reference(x, K, s, p, cip)
        assert out.shape == ref.shape, (out.shape, ref.shape)
        err = float(jnp.max(jnp.abs(out - ref)))
        assert jnp.allclose(out, ref, atol=1e-4, rtol=1e-4), (K, s, p, cip, err)

    print("KERNEL_OK")
</pallas_src>

<mosaic_0001>
module attributes {stable_mosaic.version = 11 : i64} {
  func.func @_avgpool_bn_kernel(%arg0: i32, %arg1: i32, %arg2: memref<1x4x256xf32, #tpu.memory_space<vmem>>, %arg3: memref<256x256xbf16, #tpu.memory_space<vmem>>, %arg4: memref<1x256xf32, #tpu.memory_space<vmem>>, %arg5: memref<2x4x256xf32, #tpu.memory_space<vmem>>, %arg6: memref<4x1xf32, #tpu.memory_space<vmem>>, %arg7: memref<4x1xf32, #tpu.memory_space<vmem>>) attributes {dimension_semantics = [#tpu.dimension_semantics<parallel>, #tpu.dimension_semantics<arbitrary>], iteration_bounds = array<i64: 1, 2>, scalar_prefetch = 0 : i64, scratch_operands = 2 : i64, tpu.core_type = #tpu.core_type<tc>, window_params = [{transform_indices = @transform_0, window_bounds = array<i64: 1, 4, 256>}, {pipeline_mode = #tpu.pipeline_mode<synchronous>, transform_indices = @transform_1, window_bounds = array<i64: 256, 256>}, {pipeline_mode = #tpu.pipeline_mode<synchronous>, transform_indices = @transform_2, window_bounds = array<i64: 1, 256>}, {transform_indices = @transform_3, window_bounds = array<i64: 2, 4, 256>}]} {
    %c0_i32 = arith.constant 0 : i32
    %0 = arith.cmpi eq, %arg1, %c0_i32 : i32
    %1 = arith.extui %0 : i1 to i32
    %c0_i32_0 = arith.constant 0 : i32
    %2 = arith.cmpi ne, %1, %c0_i32_0 : i32
    scf.if %2 {
      %cst_20 = arith.constant 0.000000e+00 : f32
      %29 = vector.broadcast %cst_20 : f32 to vector<4x1xf32>
      %c0_21 = arith.constant 0 : index
      %c0_22 = arith.constant 0 : index
      %30 = vector.load %arg6[%c0_21, %c0_22] : memref<4x1xf32, #tpu.memory_space<vmem>>, vector<4x1xf32>
      tpu.vector_store %arg6[%c0_21, %c0_22], %29 {strides = array<i32>} : memref<4x1xf32, #tpu.memory_space<vmem>>, vector<4x1xf32>,
      %cst_23 = arith.constant 0.000000e+00 : f32
      %31 = vector.broadcast %cst_23 : f32 to vector<4x1xf32>
      %c0_24 = arith.constant 0 : index
      %c0_25 = arith.constant 0 : index
      %32 = vector.load %arg7[%c0_24, %c0_25] : memref<4x1xf32, #tpu.memory_space<vmem>>, vector<4x1xf32>
      tpu.vector_store %arg7[%c0_24, %c0_25], %31 {strides = array<i32>} : memref<4x1xf32, #tpu.memory_space<vmem>>, vector<4x1xf32>,
    } else {
    }
    %c0 = arith.constant 0 : index
    %c0_1 = arith.constant 0 : index
    %3 = vector.load %arg3[%c0, %c0_1] : memref<256x256xbf16, #tpu.memory_space<vmem>>, vector<256x256xbf16>
    %4 = arith.extf %3 : vector<256x256xbf16> to vector<256x256xf32>
    %c0_2 = arith.constant 0 : index
    %c0_3 = arith.constant 0 : index
    %c0_4 = arith.constant 0 : index
    %5 = vector.load %arg2[%c0_2, %c0_3, %c0_4] : memref<1x4x256xf32, #tpu.memory_space<vmem>>, vector<1x4x256xf32>
    %6 = vector.shape_cast %5 : vector<1x4x256xf32> to vector<4x256xf32>
    %cst = arith.constant dense<0.000000e+00> : vector<4x256xf32>
    %7 = tpu.matmul %6, %4, %cst {dimension_numbers = #tpu.dot_dimension_numbers<[1], [0], [0], [1], [0, 0, 1, 1], [], []>} : vector<4x256xf32>, vector<256x256xf32>, vector<4x256xf32> -> vector<4x256xf32>
    %c0_5 = arith.constant 0 : index
    %c0_6 = arith.constant 0 : index
    %8 = vector.load %arg4[%c0_5, %c0_6] : memref<1x256xf32, #tpu.memory_space<vmem>>, vector<1x256xf32>
    %9 = vector.broadcast %8 : vector<1x256xf32> to vector<4x256xf32>
    %10 = arith.mulf %7, %9 : vector<4x256xf32>
    %11 = arith.index_cast %arg1 : i32 to index
    %c0_7 = arith.constant 0 : index
    %c0_8 = arith.constant 0 : index
    %12 = vector.load %arg5[%11, %c0_7, %c0_8] : memref<2x4x256xf32, #tpu.memory_space<vmem>>, vector<1x4x256xf32>
    %13 = vector.shape_cast %12 : vector<1x4x256xf32> to vector<4x256xf32>
    %14 = vector.shape_cast %10 : vector<4x256xf32> to vector<1x4x256xf32>
    tpu.vector_store %arg5[%11, %c0_7, %c0_8], %14 {strides = array<i32>} : memref<2x4x256xf32, #tpu.memory_space<vmem>>, vector<1x4x256xf32>,
    %c0_9 = arith.constant 0 : index
    %c0_10 = arith.constant 0 : index
    %15 = vector.load %arg6[%c0_9, %c0_10] : memref<4x1xf32, #tpu.memory_space<vmem>>, vector<4x1xf32>
    %cst_11 = arith.constant dense<0.000000e+00> : vector<4xf32>
    %16 = vector.multi_reduction <add>, %10, %cst_11 [1] : vector<4x256xf32> to vector<4xf32>
    %17 = vector.shape_cast %16 : vector<4xf32> to vector<4x1xf32>
    %18 = arith.addf %15, %17 : vector<4x1xf32>
    %c0_12 = arith.constant 0 : index
    %c0_13 = arith.constant 0 : index
    %19 = vector.load %arg6[%c0_12, %c0_13] : memref<4x1xf32, #tpu.memory_space<vmem>>, vector<4x1xf32>
    tpu.vector_store %arg6[%c0_12, %c0_13], %18 {strides = array<i32>} : memref<4x1xf32, #tpu.memory_space<vmem>>, vector<4x1xf32>,
    %c0_14 = arith.constant 0 : index
    %c0_15 = arith.constant 0 : index
    %20 = vector.load %arg7[%c0_14, %c0_15] : memref<4x1xf32, #tpu.memory_space<vmem>>, vector<4x1xf32>
    %21 = arith.mulf %10, %10 : vector<4x256xf32>
    %cst_16 = arith.constant dense<0.000000e+00> : vector<4xf32>
    %22 = vector.multi_reduction <add>, %21, %cst_16 [1] : vector<4x256xf32> to vector<4xf32>
    %23 = vector.shape_cast %22 : vector<4xf32> to vector<4x1xf32>
    %24 = arith.addf %20, %23 : vector<4x1xf32>
    %c0_17 = arith.constant 0 : index
    %c0_18 = arith.constant 0 : index
    %25 = vector.load %arg7[%c0_17, %c0_18] : memref<4x1xf32, #tpu.memory_space<vmem>>, vector<4x1xf32>
    tpu.vector_store %arg7[%c0_17, %c0_18], %24 {strides = array<i32>} : memref<4x1xf32, #tpu.memory_space<vmem>>, vector<4x1xf32>,
    %c1_i32 = arith.constant 1 : i32
    %26 = arith.cmpi eq, %arg1, %c1_i32 : i32
    %27 = arith.extui %26 : i1 to i32
    %c0_i32_19 = arith.constant 0 : i32
    %28 = arith.cmpi ne, %27, %c0_i32_19 : i32
    scf.if %28 {
      %c0_20 = arith.constant 0 : index
      %c0_21 = arith.constant 0 : index
      %29 = vector.load %arg6[%c0_20, %c0_21] : memref<4x1xf32, #tpu.memory_space<vmem>>, vector<4x1xf32>
      %cst_22 = arith.constant 0.001953125 : f32
      %30 = vector.broadcast %cst_22 : f32 to vector<4x1xf32>
      %31 = arith.mulf %29, %30 : vector<4x1xf32>
      %c0_23 = arith.constant 0 : index
      %c0_24 = arith.constant 0 : index
      %32 = vector.load %arg7[%c0_23, %c0_24] : memref<4x1xf32, #tpu.memory_space<vmem>>, vector<4x1xf32>
      %cst_25 = arith.constant 0.001953125 : f32
      %33 = vector.broadcast %cst_25 : f32 to vector<4x1xf32>
      %34 = arith.mulf %32, %33 : vector<4x1xf32>
      %35 = arith.mulf %31, %31 : vector<4x1xf32>
      %36 = arith.subf %34, %35 : vector<4x1xf32>
      %cst_26 = arith.constant 9.99999974E-6 : f32
      %37 = vector.broadcast %cst_26 : f32 to vector<4x1xf32>
      %38 = arith.addf %36, %37 : vector<4x1xf32>
      %39 = math.rsqrt %38 : vector<4x1xf32>
      %c0_27 = arith.constant 0 : index
      %c0_28 = arith.constant 0 : index
      %c0_29 = arith.constant 0 : index
      %40 = vector.load %arg5[%c0_27, %c0_28, %c0_29] : memref<2x4x256xf32, #tpu.memory_space<vmem>>, vector<2x4x256xf32>
      %41 = vector.shape_cast %31 : vector<4x1xf32> to vector<1x4x1xf32>
      %42 = vector.broadcast %41 : vector<1x4x1xf32> to vector<2x4x256xf32>
      %43 = arith.subf %40, %42 : vector<2x4x256xf32>
      %44 = vector.shape_cast %39 : vector<4x1xf32> to vector<1x4x1xf32>
      %45 = vector.broadcast %44 : vector<1x4x1xf32> to vector<2x4x256xf32>
      %46 = arith.mulf %43, %45 : vector<2x4x256xf32>
      %c0_30 = arith.constant 0 : index
      %c0_31 = arith.constant 0 : index
      %c0_32 = arith.constant 0 : index
      %47 = vector.load %arg5[%c0_30, %c0_31, %c0_32] : memref<2x4x256xf32, #tpu.memory_space<vmem>>, vector<2x4x256xf32>
      tpu.vector_store %arg5[%c0_30, %c0_31, %c0_32], %46 {strides = array<i32>} : memref<2x4x256xf32, #tpu.memory_space<vmem>>, vector<2x4x256xf32>,
    } else {
    }
    return
  }
  func.func @transform_0(%arg0: i32, %arg1: i32) -> (i32, i32, i32) {
    %c0_i32 = arith.constant 0 : i32
    %c0_i32_0 = arith.constant 0 : i32
    return %arg1, %arg0, %c0_i32 : i32, i32, i32
  }
  func.func @transform_1(%arg0: i32, %arg1: i32) -> (i32, i32) {
    %c0_i32 = arith.constant 0 : i32
    %c0_i32_0 = arith.constant 0 : i32
    %c0_i32_1 = arith.constant 0 : i32
    return %c0_i32, %c0_i32_0 : i32, i32
  }
  func.func @transform_2(%arg0: i32, %arg1: i32) -> (i32, i32) {
    %c0_i32 = arith.constant 0 : i32
    %c0_i32_0 = arith.constant 0 : i32
    %c0_i32_1 = arith.constant 0 : i32
    return %c0_i32, %c0_i32_0 : i32, i32
  }
  func.func @transform_3(%arg0: i32, %arg1: i32) -> (i32, i32, i32) {
    %c0_i32 = arith.constant 0 : i32
    %c0_i32_0 = arith.constant 0 : i32
    %c0_i32_1 = arith.constant 0 : i32
    return %c0_i32, %arg0, %c0_i32_0 : i32, i32, i32
  }
}

module attributes {stable_mosaic.version = 11 : i64} {
  func.func @_avgpool_bn_kernel(%arg0: i32, %arg1: i32, %arg2: memref<1x4x256xf32, #tpu.memory_space<vmem>>, %arg3: memref<256x256xbf16, #tpu.memory_space<vmem>>, %arg4: memref<1x256xf32, #tpu.memory_space<vmem>>, %arg5: memref<2x4x256xf32, #tpu.memory_space<vmem>>, %arg6: memref<4x1xf32, #tpu.memory_space<vmem>>, %arg7: memref<4x1xf32, #tpu.memory_space<vmem>>) attributes {dimension_semantics = [#tpu.dimension_semantics<parallel>, #tpu.dimension_semantics<arbitrary>], iteration_bounds = array<i64: 1, 2>, scalar_prefetch = 0 : i64, scratch_operands = 2 : i64, tpu.core_type = #tpu.core_type<tc>, window_params = [{transform_indices = @transform_0, window_bounds = array<i64: 1, 4, 256>}, {pipeline_mode = #tpu.pipeline_mode<synchronous>, transform_indices = @transform_1, window_bounds = array<i64: 256, 256>}, {pipeline_mode = #tpu.pipeline_mode<synchronous>, transform_indices = @transform_2, window_bounds = array<i64: 1, 256>}, {transform_indices = @transform_3, window_bounds = array<i64: 2, 4, 256>}]} {
    %c0_i32 = arith.constant 0 : i32
    %0 = arith.cmpi eq, %arg1, %c0_i32 : i32
    %1 = arith.extui %0 : i1 to i32
    %c0_i32_0 = arith.constant 0 : i32
    %2 = arith.cmpi ne, %1, %c0_i32_0 : i32
    scf.if %2 {
      %cst_20 = arith.constant 0.000000e+00 : f32
      %29 = vector.broadcast %cst_20 : f32 to vector<4x1xf32>
      %c0_21 = arith.constant 0 : index
      %c0_22 = arith.constant 0 : index
      %30 = vector.load %arg6[%c0_21, %c0_22] : memref<4x1xf32, #tpu.memory_space<vmem>>, vector<4x1xf32>
      tpu.vector_store %arg6[%c0_21, %c0_22], %29 {strides = array<i32>} : memref<4x1xf32, #tpu.memory_space<vmem>>, vector<4x1xf32>,
      %cst_23 = arith.constant 0.000000e+00 : f32
      %31 = vector.broadcast %cst_23 : f32 to vector<4x1xf32>
      %c0_24 = arith.constant 0 : index
      %c0_25 = arith.constant 0 : index
      %32 = vector.load %arg7[%c0_24, %c0_25] : memref<4x1xf32, #tpu.memory_space<vmem>>, vector<4x1xf32>
      tpu.vector_store %arg7[%c0_24, %c0_25], %31 {strides = array<i32>} : memref<4x1xf32, #tpu.memory_space<vmem>>, vector<4x1xf32>,
    } else {
    }
    %c0 = arith.constant 0 : index
    %c0_1 = arith.constant 0 : index
    %3 = vector.load %arg3[%c0, %c0_1] : memref<256x256xbf16, #tpu.memory_space<vmem>>, vector<256x256xbf16>
    %4 = arith.extf %3 : vector<256x256xbf16> to vector<256x256xf32>
    %c0_2 = arith.constant 0 : index
    %c0_3 = arith.constant 0 : index
    %c0_4 = arith.constant 0 : index
    %5 = vector.load %arg2[%c0_2, %c0_3, %c0_4] : memref<1x4x256xf32, #tpu.memory_space<vmem>>, vector<1x4x256xf32>
    %6 = vector.shape_cast %5 : vector<1x4x256xf32> to vector<4x256xf32>
    %cst = arith.constant dense<0.000000e+00> : vector<4x256xf32>
    %7 = tpu.matmul %6, %4, %cst {dimension_numbers = #tpu.dot_dimension_numbers<[1], [0], [0], [1], [0, 0, 1, 1], [], []>} : vector<4x256xf32>, vector<256x256xf32>, vector<4x256xf32> -> vector<4x256xf32>
    %c0_5 = arith.constant 0 : index
    %c0_6 = arith.constant 0 : index
    %8 = vector.load %arg4[%c0_5, %c0_6] : memref<1x256xf32, #tpu.memory_space<vmem>>, vector<1x256xf32>
    %9 = vector.broadcast %8 : vector<1x256xf32> to vector<4x256xf32>
    %10 = arith.mulf %7, %9 : vector<4x256xf32>
    %11 = arith.index_cast %arg1 : i32 to index
    %c0_7 = arith.constant 0 : index
    %c0_8 = arith.constant 0 : index
    %12 = vector.load %arg5[%11, %c0_7, %c0_8] : memref<2x4x256xf32, #tpu.memory_space<vmem>>, vector<1x4x256xf32>
    %13 = vector.shape_cast %12 : vector<1x4x256xf32> to vector<4x256xf32>
    %14 = vector.shape_cast %10 : vector<4x256xf32> to vector<1x4x256xf32>
    tpu.vector_store %arg5[%11, %c0_7, %c0_8], %14 {strides = array<i32>} : memref<2x4x256xf32, #tpu.memory_space<vmem>>, vector<1x4x256xf32>,
    %c0_9 = arith.constant 0 : index
    %c0_10 = arith.constant 0 : index
    %15 = vector.load %arg6[%c0_9, %c0_10] : memref<4x1xf32, #tpu.memory_space<vmem>>, vector<4x1xf32>
    %cst_11 = arith.constant dense<0.000000e+00> : vector<4xf32>
    %16 = vector.multi_reduction <add>, %10, %cst_11 [1] : vector<4x256xf32> to vector<4xf32>
    %17 = vector.shape_cast %16 : vector<4xf32> to vector<4x1xf32>
    %18 = arith.addf %15, %17 : vector<4x1xf32>
    %c0_12 = arith.constant 0 : index
    %c0_13 = arith.constant 0 : index
    %19 = vector.load %arg6[%c0_12, %c0_13] : memref<4x1xf32, #tpu.memory_space<vmem>>, vector<4x1xf32>
    tpu.vector_store %arg6[%c0_12, %c0_13], %18 {strides = array<i32>} : memref<4x1xf32, #tpu.memory_space<vmem>>, vector<4x1xf32>,
    %c0_14 = arith.constant 0 : index
    %c0_15 = arith.constant 0 : index
    %20 = vector.load %arg7[%c0_14, %c0_15] : memref<4x1xf32, #tpu.memory_space<vmem>>, vector<4x1xf32>
    %21 = arith.mulf %10, %10 : vector<4x256xf32>
    %cst_16 = arith.constant dense<0.000000e+00> : vector<4xf32>
    %22 = vector.multi_reduction <add>, %21, %cst_16 [1] : vector<4x256xf32> to vector<4xf32>
    %23 = vector.shape_cast %22 : vector<4xf32> to vector<4x1xf32>
    %24 = arith.addf %20, %23 : vector<4x1xf32>
    %c0_17 = arith.constant 0 : index
    %c0_18 = arith.constant 0 : index
    %25 = vector.load %arg7[%c0_17, %c0_18] : memref<4x1xf32, #tpu.memory_space<vmem>>, vector<4x1xf32>
    tpu.vector_store %arg7[%c0_17, %c0_18], %24 {strides = array<i32>} : memref<4x1xf32, #tpu.memory_space<vmem>>, vector<4x1xf32>,
    %c1_i32 = arith.constant 1 : i32
    %26 = arith.cmpi eq, %arg1, %c1_i32 : i32
    %27 = arith.extui %26 : i1 to i32
    %c0_i32_19 = arith.constant 0 : i32
    %28 = arith.cmpi ne, %27, %c0_i32_19 : i32
    scf.if %28 {
      %c0_20 = arith.constant 0 : index
      %c0_21 = arith.constant 0 : index
      %29 = vector.load %arg6[%c0_20, %c0_21] : memref<4x1xf32, #tpu.memory_space<vmem>>, vector<4x1xf32>
      %cst_22 = arith.constant 0.001953125 : f32
      %30 = vector.broadcast %cst_22 : f32 to vector<4x1xf32>
      %31 = arith.mulf %29, %30 : vector<4x1xf32>
      %c0_23 = arith.constant 0 : index
      %c0_24 = arith.constant 0 : index
      %32 = vector.load %arg7[%c0_23, %c0_24] : memref<4x1xf32, #tpu.memory_space<vmem>>, vector<4x1xf32>
      %cst_25 = arith.constant 0.001953125 : f32
      %33 = vector.broadcast %cst_25 : f32 to vector<4x1xf32>
      %34 = arith.mulf %32, %33 : vector<4x1xf32>
      %35 = arith.mulf %31, %31 : vector<4x1xf32>
      %36 = arith.subf %34, %35 : vector<4x1xf32>
      %cst_26 = arith.constant 9.99999974E-6 : f32
      %37 = vector.broadcast %cst_26 : f32 to vector<4x1xf32>
      %38 = arith.addf %36, %37 : vector<4x1xf32>
      %39 = math.rsqrt %38 : vector<4x1xf32>
      %c0_27 = arith.constant 0 : index
      %c0_28 = arith.constant 0 : index
      %c0_29 = arith.constant 0 : index
      %40 = vector.load %arg5[%c0_27, %c0_28, %c0_29] : memref<2x4x256xf32, #tpu.memory_space<vmem>>, vector<2x4x256xf32>
      %41 = vector.shape_cast %31 : vector<4x1xf32> to vector<1x4x1xf32>
      %42 = vector.broadcast %41 : vector<1x4x1xf32> to vector<2x4x256xf32>
      %43 = arith.subf %40, %42 : vector<2x4x256xf32>
      %44 = vector.shape_cast %39 : vector<4x1xf32> to vector<1x4x1xf32>
      %45 = vector.broadcast %44 : vector<1x4x1xf32> to vector<2x4x256xf32>
      %46 = arith.mulf %43, %45 : vector<2x4x256xf32>
      %c0_30 = arith.constant 0 : index
      %c0_31 = arith.constant 0 : index
      %c0_32 = arith.constant 0 : index
      %47 = vector.load %arg5[%c0_30, %c0_31, %c0_32] : memref<2x4x256xf32, #tpu.memory_space<vmem>>, vector<2x4x256xf32>
      tpu.vector_store %arg5[%c0_30, %c0_31, %c0_32], %46 {strides = array<i32>} : memref<2x4x256xf32, #tpu.memory_space<vmem>>, vector<2x4x256xf32>,
    } else {
    }
    return
  }
  func.func @transform_0(%arg0: i32, %arg1: i32) -> (i32, i32, i32) {
    %c0_i32 = arith.constant 0 : i32
    %c0_i32_0 = arith.constant 0 : i32
    return %arg1, %arg0, %c0_i32 : i32, i32, i32
  }
  func.func @transform_1(%arg0: i32, %arg1: i32) -> (i32, i32) {
    %c0_i32 = arith.constant 0 : i32
    %c0_i32_0 = arith.constant 0 : i32
    %c0_i32_1 = arith.constant 0 : i32
    return %c0_i32, %c0_i32_0 : i32, i32
  }
  func.func @transform_2(%arg0: i32, %arg1: i32) -> (i32, i32) {
    %c0_i32 = arith.constant 0 : i32
    %c0_i32_0 = arith.constant 0 : i32
    %c0_i32_1 = arith.constant 0 : i32
    return %c0_i32, %c0_i32_0 : i32, i32
  }
  func.func @transform_3(%arg0: i32, %arg1: i32) -> (i32, i32, i32) {
    %c0_i32 = arith.constant 0 : i32
    %c0_i32_0 = arith.constant 0 : i32
    %c0_i32_1 = arith.constant 0 : i32
    return %c0_i32, %arg0, %c0_i32_0 : i32, i32, i32
  }
}

</mosaic_0001>

<bundles_post_ra>
// kernel: tpu_custom_call.1
= control target key start
LH: loop header
LB: loop body
LE: loop exit
PB: predicated region body
PF: predicated region fallthrough
CT: control target
= control target key end

     0   :  { %8 = vsyncpa [#allocation5], 0  ;;  %s986_s0 = inlined_call_operand.hbm [shape: f32[2,4,256], index: 0, kind: input, shape index: {}]   ;;  %s987_s1 = inlined_call_operand.hbm [shape: bf16[256,256], index: 1, kind: input, shape index: {}]   ;;  %s988_s2 = inlined_call_operand.vmem [shape: f32[1,256], index: 2, kind: input, shape index: {}]   ;;  %s989_s3 = inlined_call_operand.hbm [shape: f32[2,4,256], index: 3, kind: output, shape index: {}]  }
   0x1   :  { %10 = vsyncpa [#allocation5 + $0x1], 0 }
   0x2   :  { %11 = vsyncpa [#allocation8], 0 }
   0x3   :  { %12 = vsyncpa [#allocation6], 0  ;;  %s835_s12 = smov 0   ;;  %s837_s13 = smov 0  }
   0x4   :  { %s839_s14 = smov 0   ;;  %s841_s15 = smov 0  }
   0x5   :  { %s843_s16 = smov 0   ;;  %s845_s17 = smov 0  }
   0x6 LB: > { %s563_s18 = sadd.s32 4294967295, %s803_s17   ;;  %p52_p0 = scmp.ne.s32.totalorder %s787_s13, %s783_s12  ;;  %s803_s17 = sphi %s845_s17, %s18_s17   ;;  %s799_s16 = sphi %s843_s16, %s1000_s16   ;;  %s795_s15 = sphi %s841_s15, %s999_s15   ;;  %s791_s14 = sphi %s839_s14, %s998_s14   ;;  %s787_s13 = sphi %s837_s13, %s997_s13   ;;  %s783_s12 = sphi %s835_s12, %s996_s12  }
   0x7   : > { %p867_p1 = scmp.eq.s32.totalorder %s563_s18, 0  ;;  %p564_p2 = scmp.ge.s32.totalorder %s803_s17, 1 }
   0x8   : > { %p131_p3 = scmp.lt.s32.totalorder %s803_s17, 3  ;;  %s805_s22 = smov [#allocation7]  }
   0x9   : > { %p875_p4 = por %p867_p1, %p52_p0  ;;  %s143_s23 = sshll.u32 %s805_s22, 4  ;;  %s144_s23 = int_to_ptr.vmem [resolvable:$true] %s143_s23 }
   0xa   : > { %p879_p5 = pnand %p564_p2, %p131_p3  ;;  %s27_s25 = sadd.s32 1, %s799_s16 }
   0xb   : > { %s678_s26 = scalar_lea.vmem %s144_s23, 4096  ;;  %p686_p12 = scmp.lt.s32.totalorder %s144_s23, %s144_s23 }
   0xc   : > { %p593_p6 = pneg %p879_p5  ;;  %p679_p9 = scmp.ne.s32.totalorder %s144_s23, %s678_s26 }
   0xd   : > { %p687_p13 = scmp.lt.s32.totalorder %s678_s26, %s678_s26 }
   0xe   : > { %p887_p7 = pnand %p593_p6, %p867_p1 }
   0xf   : > { %p688_p0 = por %p687_p13, %p686_p12 }
  0x10   : > { %p669_p8 = pneg %p887_p7 }
  0x12   : > { %p681_p10 = pnand %p679_p9, %p669_p8 }
  0x14   : > { %p682_p11 = pneg %p681_p10 }
  0x16   : > { %p689_p2 = pnand %p688_p0, %p682_p11 }
  0x18   : > { %692 = shalt.err (!%p689_p2)
}
  0x19   : > { %s806_s27 = smov 128   ;;  %s807_s28 = smov 8  }
  0x1a   : > { %596 = dma.hbm_to_vmem [thread:$0]  (!%p887_p7), %s987_s1, 4096, %s144_s23, [#allocation8], %s806_s27, %s806_s27, %s807_s28  }
  0x1b   : > { %p28_p3 = scmp.ge.s32.totalorder %s27_s25, 2  ;;  %s39_s4 = sadd.s32 1, %s791_s14 }
  0x1c   : > { %p46_p6 = scmp.ne.s32.totalorder %s791_s14, %s787_s13  ;;  %p47_p8 = scmp.eq.s32.totalorder %s803_s17, 0 }
  0x1d   : > { %s1002_s25 = smov (%p28_p3, %s27_s25), 0  ;;  %p602_p10 = scmp.lt.s32.totalorder %s803_s17, 2 }
  0x1e   : > { %p48_p9 = por %p47_p8, %p46_p6  ;;  %s34_s5 = ssub.s32 %s799_s16, %s1002_s25 }
  0x1f   : > { %s160_s6 = sand.u32 1, %s791_s14   ;;  %p37_p11 = scmp.eq.s32.totalorder %s34_s5, 0 }
  0x20   : > { %s567_s7 = sshll.u32 %s160_s6, 3  ;;  %s581_s8 = sshll.u32 %s799_s16, 7 }
  0x21   : > { %s911_s9 = scalar_select %p37_p11, %s791_s14, %s39_s4  }
  0x22   : > { %s172_s12 = scalar_lea.hbm %s986_s0, %s581_s8  ;;  %s164_s22 = scalar_lea.vmem [#allocation4], %s567_s7 }
  0x23   : > { %s174_s23 = sshll.u32 %s164_s22, 4  ;;  %p916_p7 = pnand %p602_p10, %p48_p9  ;;  %s175_s23 = int_to_ptr.vmem [resolvable:$true] %s174_s23 }
  0x24   : > { %s161_s26 = scalar_lea.sflag [#allocation5], %s160_s6  ;;  %s706_s27 = scalar_lea.vmem %s175_s23, 128 }
  0x25   : > { %p695_p12 = pneg %p916_p7  ;;  %p707_p13 = scmp.ne.s32.totalorder %s175_s23, %s706_s27 }
  0x26   : > { %s808_s28 = smov [#allocation4]  }
  0x27   : > { %p709_p0 = pnand %p707_p13, %p695_p12  ;;  %s711_s29 = sshll.u32 %s808_s28, 4  ;;  %s712_s29 = int_to_ptr.vmem [resolvable:$false] %s711_s29 }
  0x28   : > { %s713_s30 = scalar_lea.vmem %s712_s29, 256  ;;  %p714_p3 = scmp.lt.s32.totalorder %s175_s23, %s712_s29 }
  0x29   : > { %p710_p2 = pneg %p709_p0  ;;  %p715_p6 = scmp.lt.s32.totalorder %s713_s30, %s706_s27 }
  0x2b   : > { %p716_p8 = por %p715_p6, %p714_p3 }
  0x2d   : > { %p717_p9 = pnand %p716_p8, %p710_p2 }
  0x2f   : > { %720 = shalt.err (!%p717_p9)
}
  0x30   : > { %600 = dma.hbm_to_vmem [thread:$0]  (!%p916_p7), %s172_s12, 128, %s175_s23, %s161_s26  }
  0x31   : > { %183 = sbr.rel (%p879_p5) target bundleno = 650 (0x28a), region = 32  ;;  %s185_s4 = sand.u32 (!%p879_p5), 1, %s787_s13  }
  0x32   : > { %s927_s5 = sshll.u32 (!%p879_p5), %s185_s4, 3  ;;  %s186_s6 = scalar_lea.sflag (!%p879_p5), [#allocation5], %s185_s4 }
  0x33   : > { %s189_s7 = scalar_lea.vmem (!%p879_p5), [#allocation4], %s927_s5 }
  0x36   : > { %770 = dma.done.wait (%p875_p4), %s186_s6, 128  }
  0x37   : > { %772 = vsyncadd (%p875_p4), %s186_s6, 4294967168 }
  0x38   : > { %774 = dma.done.wait (%p867_p1), [#allocation8], 4096  }
  0x39   : > { %776 = vsyncadd (%p867_p1), [#allocation8], 4294963200  ;;  %p573_p5 = scmp.ne.s32.totalorder %s795_s15, 0 }
  0x3b   : > { %214 = sbr.rel (%p573_p5) target bundleno = 66 (0x42), region = 44 }
  0x40   : > { %vm215_vm0 = vcmask 3072   ;;  %v809_v0 = vmov 0.0  }
  0x41   : > { %216 = vst.msk [vmem:[#allocation2] sm:$0xf] %vm215_vm0, %v809_v0  ;;  %217 = vst.msk [vmem:[#allocation3] sm:$0xf] %vm215_vm0, %v809_v0 }
  0x42 PF: > { %v233_v1 = vld [vmem:[#allocation7 + $0x78] sm:$0xff]  ;;  %v232_v2 = vld [vmem:[#allocation7 + $0x70] sm:$0xff]  ;;  %v231_v3 = vld [vmem:[#allocation7 + $0x68] sm:$0xff]  ;;  %s582_s21 = sshll.u32 %s795_s15, 3  ;;  %vm412_vm1 = vcmask 1043456   ;;  %vm419_vm2 = vcmask 3072  }
  0x43   : > { %v281_v4 = vunpack.c.h.bf16 %v233_v1  ;;  %v280_v5 = vunpack.c.l.bf16 %v233_v1  ;;  %v279_v6 = vunpack.c.h.bf16 %v232_v2  ;;  %v278_v7 = vunpack.c.l.bf16 %v232_v2  ;;  %v230_v8 = vld [vmem:[#allocation7 + $0x60] sm:$0xff]  ;;  %v229_v11 = vld [vmem:[#allocation7 + $0x58] sm:$0xff]  ;;  %v228_v14 = vld [vmem:[#allocation7 + $0x50] sm:$0xff]  ;;  %s409_s8 = scalar_lea.vmem [#allocation9], %s582_s21  ;;  %p576_p1 = scmp.ne.s32.totalorder %s795_s15, 1 }
  0x44   : > { %v277_v9 = vunpack.c.h.bf16 %v231_v3  ;;  %v276_v10 = vunpack.c.l.bf16 %v231_v3  ;;  %v275_v12 = vunpack.c.h.bf16 %v230_v8  ;;  %v274_v13 = vunpack.c.l.bf16 %v230_v8  ;;  %v227_v17 = vld [vmem:[#allocation7 + $0x48] sm:$0xff]  ;;  %v226_v20 = vld [vmem:[#allocation7 + $0x40] sm:$0xff]  ;;  %v225_v23 = vld [vmem:[#allocation7 + $0x38] sm:$0xff] }
  0x45   : > { %318 = vmatprep.subr.mxu0 %v281_v4  ;;  %v273_v15 = vunpack.c.h.bf16 %v229_v11  ;;  %v272_v16 = vunpack.c.l.bf16 %v229_v11  ;;  %v271_v18 = vunpack.c.h.bf16 %v228_v14  ;;  %v270_v19 = vunpack.c.l.bf16 %v228_v14  ;;  %v224_v26 = vld [vmem:[#allocation7 + $0x30] sm:$0xff]  ;;  %v223_v30 = vld [vmem:[#allocation7 + $0x28] sm:$0xff]  ;;  %v222_v34 = vld [vmem:[#allocation7 + $0x20] sm:$0xff] }
  0x46   : > { %319 = vmatpush1.msra.mxu0 %v280_v5  ;;  %v269_v21 = vunpack.c.h.bf16 %v227_v17  ;;  %v268_v22 = vunpack.c.l.bf16 %v227_v17  ;;  %v267_v24 = vunpack.c.h.bf16 %v226_v20  ;;  %v266_v25 = vunpack.c.l.bf16 %v226_v20  ;;  %v941_v27 = vld [vmem:[%s189_s7] sm:$0xff]  ;;  %v219_v43 = vld [vmem:[#allocation7 + $0x8] sm:$0xff]  ;;  %v218_v46 = vld [vmem:[#allocation7] sm:$0xff] }
  0x47   : > { %320 = vmatprep.subr.mxu0 %v279_v6  ;;  %v265_v28 = vunpack.c.h.bf16 %v225_v23  ;;  %v264_v29 = vunpack.c.l.bf16 %v225_v23  ;;  %v263_v31 = vunpack.c.h.bf16 %v224_v26  ;;  %v316_v32 = vcombine.high %v941_v27, %v941_v27  ;;  %v221_v37 = vld [vmem:[#allocation7 + $0x18] sm:$0xff]  ;;  %v220_v40 = vld [vmem:[#allocation7 + $0x10] sm:$0xff]  ;;  %v247_v55 = vld [vmem:[#allocation7 + $0xe8] sm:$0xff] }
  0x48   : > { %321 = vmatpush1.msra.mxu0 %v278_v7  ;;  %v262_v33 = vunpack.c.l.bf16 %v224_v26  ;;  %v261_v35 = vunpack.c.h.bf16 %v223_v30  ;;  %v260_v36 = vunpack.c.l.bf16 %v223_v30  ;;  %v259_v38 = vunpack.c.h.bf16 %v222_v34  ;;  %v249_v49 = vld [vmem:[#allocation7 + $0xf8] sm:$0xff]  ;;  %v248_v52 = vld [vmem:[#allocation7 + $0xf0] sm:$0xff]  ;;  %v246_v58 = vld [vmem:[#allocation7 + $0xe0] sm:$0xff] }
  0x49   : > { %322 = vmatprep.subr.mxu0 %v277_v9  ;;  %382 = vmatprep.mubr.f32.mxu0 %v316_v32  ;;  %v258_v39 = vunpack.c.l.bf16 %v222_v34  ;;  %v257_v41 = vunpack.c.h.bf16 %v221_v37  ;;  %v256_v42 = vunpack.c.l.bf16 %v221_v37  ;;  %v255_v44 = vunpack.c.h.bf16 %v220_v40  ;;  %v245_v61 = vld [vmem:[#allocation7 + $0xd8] sm:$0xff]  ;;  %v244_v0 = vld [vmem:[#allocation7 + $0xd0] sm:$0xff]  ;;  %v243_v3 = vld [vmem:[#allocation7 + $0xc8] sm:$0xff] }
  0x4a   : > { %323 = vmatpush1.msra.mxu0 %v276_v10  ;;  %v254_v45 = vunpack.c.l.bf16 %v220_v40  ;;  %v253_v47 = vunpack.c.h.bf16 %v219_v43  ;;  %v252_v48 = vunpack.c.l.bf16 %v219_v43  ;;  %v251_v50 = vunpack.c.h.bf16 %v218_v46  ;;  %v242_v6 = vld [vmem:[#allocation7 + $0xc0] sm:$0xff]  ;;  %v241_v9 = vld [vmem:[#allocation7 + $0xb8] sm:$0xff] }
  0x4b   : > { %324 = vmatprep.subr.mxu0 %v275_v12  ;;  %v250_v51 = vunpack.c.l.bf16 %v218_v46  ;;  %v313_v53 = vunpack.c.h.bf16 %v249_v49  ;;  %v312_v54 = vunpack.c.l.bf16 %v249_v49  ;;  %v311_v56 = vunpack.c.h.bf16 %v248_v52  ;;  %v240_v12 = vld [vmem:[#allocation7 + $0xb0] sm:$0xff] }
  0x4c   : > { %325 = vmatpush1.msra.mxu0 %v274_v13  ;;  %v310_v57 = vunpack.c.l.bf16 %v248_v52  ;;  %v309_v59 = vunpack.c.h.bf16 %v247_v55  ;;  %v308_v60 = vunpack.c.l.bf16 %v247_v55  ;;  %v307_v62 = vunpack.c.h.bf16 %v246_v58  ;;  %v411_v55 = vld [vmem:[#allocation2] sm:$0xf] }
  0x4d   : > { %326 = vmatprep.subr.mxu0 %v273_v15  ;;  %v306_v63 = vunpack.c.l.bf16 %v246_v58  ;;  %v305_v1 = vunpack.c.h.bf16 %v245_v61  ;;  %v304_v2 = vunpack.c.l.bf16 %v245_v61  ;;  %v303_v4 = vunpack.c.h.bf16 %v244_v0  ;;  %v239_v15 = vld [vmem:[#allocation7 + $0xa8] sm:$0xff] }
  0x4e   : > { %327 = vmatpush1.msra.mxu0 %v272_v16  ;;  %v302_v5 = vunpack.c.l.bf16 %v244_v0  ;;  %v301_v7 = vunpack.c.h.bf16 %v243_v3  ;;  %v300_v8 = vunpack.c.l.bf16 %v243_v3  ;;  %v299_v10 = vunpack.c.h.bf16 %v242_v6  ;;  %v421_v58 = vld [vmem:[#allocation3] sm:$0xf] }
  0x4f   : > { %328 = vmatprep.subr.mxu0 %v271_v18  ;;  %v298_v11 = vunpack.c.l.bf16 %v242_v6  ;;  %v297_v13 = vunpack.c.h.bf16 %v241_v9  ;;  %v296_v14 = vunpack.c.l.bf16 %v241_v9  ;;  %v295_v16 = vunpack.c.h.bf16 %v240_v12  ;;  %v238_v18 = vld [vmem:[#allocation7 + $0xa0] sm:$0xff] }
  0x50   : > { %329 = vmatpush1.msra.mxu0 %v270_v19  ;;  %v294_v17 = vunpack.c.l.bf16 %v240_v12  ;;  %v293_v19 = vunpack.c.h.bf16 %v239_v15  ;;  %v292_v20 = vunpack.c.l.bf16 %v239_v15  ;;  %v290_v23 = vunpack.c.l.bf16 %v238_v18 }
  0x51   : > { %330 = vmatprep.subr.mxu0 %v269_v21  ;;  %v237_v21 = vld [vmem:[#allocation7 + $0x98] sm:$0xff] }
  0x52   : > { %331 = vmatpush1.msra.mxu0 %v268_v22  ;;  %v291_v22 = vunpack.c.h.bf16 %v238_v18  ;;  %v288_v26 = vunpack.c.l.bf16 %v237_v21 }
  0x53   : > { %332 = vmatprep.subr.mxu0 %v267_v24  ;;  %v236_v24 = vld [vmem:[#allocation7 + $0x90] sm:$0xff] }
  0x54   : > { %333 = vmatpush1.msra.mxu0 %v266_v25  ;;  %v289_v25 = vunpack.c.h.bf16 %v237_v21  ;;  %v286_v30 = vunpack.c.l.bf16 %v236_v24 }
  0x55   : > { %334 = vmatprep.subr.mxu0 %v265_v28  ;;  %v235_v28 = vld [vmem:[#allocation7 + $0x88] sm:$0xff] }
  0x56   : > { %335 = vmatpush1.msra.mxu0 %v264_v29  ;;  %v287_v29 = vunpack.c.h.bf16 %v236_v24  ;;  %v285_v32 = vunpack.c.h.bf16 %v235_v28 }
  0x57   : > { %336 = vmatprep.subr.mxu0 %v263_v31  ;;  %v234_v31 = vld [vmem:[#allocation7 + $0x80] sm:$0xff] }
  0x58   : > { %337 = vmatpush1.msra.mxu0 %v262_v33  ;;  %v284_v33 = vunpack.c.l.bf16 %v235_v28  ;;  %v283_v34 = vunpack.c.h.bf16 %v234_v31 }
  0x59   : > { %338 = vmatprep.subr.mxu0 %v261_v35  ;;  %v282_v35 = vunpack.c.l.bf16 %v234_v31 }
  0x5a   : > { %339 = vmatpush1.msra.mxu0 %v260_v36  ;;  %v391_v36 = vlaneseq }
  0x5b   : > { %340 = vmatprep.subr.mxu0 %v259_v38 }
  0x5c   : > { %341 = vmatpush1.msra.mxu0 %v258_v39  ;;  %v392_v37 = vshrl.u32 %v391_v36, 7  ;;  %v389_v39 = vld [vmem:[%s988_s2] sm:$0x3] }
  0x5d   : > { %342 = vmatprep.subr.mxu0 %v257_v41 }
  0x5e   : > { %343 = vmatpush1.msra.mxu0 %v256_v42  ;;  %v393_v38 = vsub.s32 0, %v392_v37  ;;  %v397_v40 = vsub.s32 1, %v392_v37 }
  0x5f   : > { %344 = vmatprep.subr.mxu0 %v255_v44 }
  0x60   : > { %345 = vmatpush1.msra.mxu0 %v254_v45  ;;  %v394_v41 = vrot.slane %v389_v39, %v393_v38  ;;  %v398_v42 = vrot.slane %v389_v39, %v397_v40 }
  0x61   : > { %346 = vmatprep.subr.mxu0 %v253_v47 }
  0x62   : > { %347 = vmatpush1.msra.mxu0 %v252_v48 }
  0x63   : > { %348 = vmatprep.subr.mxu0 %v251_v50 }
  0x64   : > { %349 = vmatpush1.msra.mxu0 %v250_v51 }
  0x65   : > { %350 = vmatprep.subr.mxu0 %v313_v53 }
  0x66   : > { %351 = vmatpush2.msra.mxu0 %v312_v54 }
  0x67   : > { %352 = vmatprep.subr.mxu0 %v311_v56 }
  0x68   : > { %353 = vmatpush2.msra.mxu0 %v310_v57 }
  0x69   : > { %354 = vmatprep.subr.mxu0 %v309_v59 }
  0x6a   : > { %355 = vmatpush2.msra.mxu0 %v308_v60 }
  0x6b   : > { %356 = vmatprep.subr.mxu0 %v307_v62 }
  0x6c   : > { %357 = vmatpush2.msra.mxu0 %v306_v63 }
  0x6d   : > { %358 = vmatprep.subr.mxu0 %v305_v1 }
  0x6e   : > { %359 = vmatpush2.msra.mxu0 %v304_v2 }
  0x6f   : > { %360 = vmatprep.subr.mxu0 %v303_v4 }
  0x70   : > { %361 = vmatpush2.msra.mxu0 %v302_v5 }
  0x71   : > { %362 = vmatprep.subr.mxu0 %v301_v7 }
  0x72   : > { %363 = vmatpush2.msra.mxu0 %v300_v8 }
  0x73   : > { %364 = vmatprep.subr.mxu0 %v299_v10 }
  0x74   : > { %365 = vmatpush2.msra.mxu0 %v298_v11 }
  0x75   : > { %366 = vmatprep.subr.mxu0 %v297_v13 }
  0x76   : > { %367 = vmatpush2.msra.mxu0 %v296_v14 }
  0x77   : > { %368 = vmatprep.subr.mxu0 %v295_v16 }
  0x78   : > { %369 = vmatpush2.msra.mxu0 %v294_v17 }
  0x79   : > { %370 = vmatprep.subr.mxu0 %v293_v19 }
  0x7a   : > { %371 = vmatpush2.msra.mxu0 %v292_v20 }
  0x7b   : > { %372 = vmatprep.subr.mxu0 %v291_v22 }
  0x7c   : > { %373 = vmatpush2.msra.mxu0 %v290_v23 }
  0x7d   : > { %374 = vmatprep.subr.mxu0 %v289_v25 }
  0x7e   : > { %375 = vmatpush2.msra.mxu0 %v288_v26 }
  0x7f   : > { %376 = vmatprep.subr.mxu0 %v287_v29 }
  0x80   : > { %377 = vmatpush2.msra.mxu0 %v286_v30 }
  0x81   : > { %378 = vmatprep.subr.mxu0 %v285_v32 }
  0x82   : > { %379 = vmatpush2.msra.mxu0 %v284_v33 }
  0x83   : > { %380 = vmatprep.subr.mxu0 %v283_v34 }
  0x84   : > { %381 = vmatpush2.msra.mxu0 %v282_v35 }
  0x85   : > { %383 = vmatmul.mubr.f32.vlgmr.msra.gmra.mxu0 %v941_v27 }
 0x145   : > { %v384_v43 = vpop.f32.mrf.mxu0 }
 0x146   : > { %v401_v44 = vmul.f32 %v394_v41, %v384_v43 }
 0x147   : > { %v386_v45 = vpop.f32.mrf.mxu0 }
 0x148   : > { %v402_v46 = vmul.f32 %v398_v42, %v386_v45  ;;  %v413_v47 = vsel %vm412_vm1, %v401_v44, 0.0  ;;  %v422_v27 = vmul.f32 %v401_v44, %v401_v44 }
 0x14a   : > { %v405_v48 = vcombine.low %v401_v44, %v402_v46  ;;  %v414_v49 = vsel %vm412_vm1, %v402_v46, 0.0  ;;  %v423_v50 = vmul.f32 %v402_v46, %v402_v46  ;;  %v424_v53 = vsel %vm412_vm1, %v422_v27, 0.0 }
 0x14b   : > { %v415_v51 = vadd.f32 %v414_v49, %v413_v47 }
 0x14c   : > { %410 = vst [vmem:[%s409_s8] sm:$0xff] %v405_v48  ;;  %v425_v52 = vsel %vm412_vm1, %v423_v50, 0.0 }
 0x14d   : > { %416 = vadd.xlane.f32.xlu0 %v415_v51  ;;  %v426_v54 = vadd.f32 %v425_v52, %v424_v53 }
 0x151   : > { %427 = vadd.xlane.f32.xlu0 %v426_v54 }
 0x1d6   : > { %v417_v56 = vpop.xlane.xlu0 %416 }
 0x1d7   : > { %v418_v57 = vadd.f32 %v417_v56, %v411_v55 }
 0x1d9   : > { %420 = vst.msk [vmem:[#allocation2] sm:$0xf] %vm419_vm2, %v418_v57  ;;  %434 = sbr.rel (%p576_p1) target bundleno = 634 (0x27a), region = 48 }
 0x1da   : > { %v428_v59 = vpop.xlane.xlu0 %427 }
 0x1db   : > { %v429_v60 = vadd.f32 %v428_v59, %v421_v58 }
 0x1dd   : > { %430 = vst.msk [vmem:[#allocation3] sm:$0xf] %vm419_vm2, %v429_v60 }
 0x1de   : > { %v810_v63 = vmov 0   ;;  %v811_v6 = vmov 839922192   ;;  %v443_v12 = vld [vmem:[#allocation9] sm:$0xff]  ;;  %v444_v13 = vld [vmem:[#allocation9 + $0x8] sm:$0xff] }
 0x1df   : > { %664 = vset.pattern.permute.xlu0 %v810_v63  ;;  %v450_v7 = vunpack.c.l.s4 %v811_v6 }
 0x1e0   : > { %v435_v61 = vld [vmem:[#allocation2] sm:$0xf] }
 0x1e1   : > { %v436_v0 = vmul.f32 0.001953125, %v435_v61  ;;  %v451_v8 = vunpack.c.0.s8 %v450_v7 }
 0x1e3   : > { %447 = vperm.xlu0 %664, %v436_v0   ;;  %v439_v2 = vmul.f32 %v436_v0, %v436_v0  ;;  %v454_v9 = vsub.s32 %v451_v8, %v392_v37 }
 0x1e4   : > { %v437_v62 = vld [vmem:[#allocation3] sm:$0xf] }
 0x1e5   : > { %v438_v1 = vmul.f32 0.001953125, %v437_v62 }
 0x1e7   : > { %v440_v3 = vsub.f32 %v438_v1, %v439_v2 }
 0x1e9   : > { %v441_v4 = vadd.f32 1e-05, %v440_v3 }
 0x1eb   : > { %665 = vrsqrt.f32 %v441_v4 }
 0x1f8   : > { %v666_v5 = vpop.eup %665 }
 0x1f9   : > { %461 = vperm.xlu0 %664, %v666_v5  }
 0x25e   : > { %v448_v10 = vpop.permute.xlu0 %447 }
 0x25f   : > { %v455_v11 = vrot.slane %v448_v10, %v454_v9 }
 0x261   : > { %v457_v15 = vsub.f32 %v443_v12, %v455_v11  ;;  %v458_v16 = vsub.f32 %v444_v13, %v455_v11 }
 0x274   : > { %v462_v14 = vpop.permute.xlu0 %461 }
 0x275   : > { %v469_v17 = vrot.slane %v462_v14, %v454_v9 }
 0x277   : > { %v471_v18 = vmul.f32 %v469_v17, %v457_v15  ;;  %v472_v19 = vmul.f32 %v469_v17, %v458_v16 }
 0x279   : > { %473 = vst [vmem:[#allocation9] sm:$0xff] %v471_v18  ;;  %474 = vst [vmem:[#allocation9 + $0x8] sm:$0xff] %v472_v19 }
 0x27a PF: > { %p953_p4 = scmp.eq.s32.totalorder %s563_s18, 1  ;;  %s812_s10 = smov [#allocation9]  }
 0x27b   : > { %s484_s11 = sshll.u32 %s812_s10, 4  ;;  %s485_s11 = int_to_ptr.vmem [resolvable:$true] %s484_s11 }
 0x27c   : > { %s721_s12 = scalar_lea.vmem %s485_s11, 256  ;;  %p728_p12 = scmp.lt.s32.totalorder %s485_s11, %s485_s11 }
 0x27d   : > { %p722_p10 = scmp.ne.s32.totalorder %s485_s11, %s721_s12  ;;  %p729_p13 = scmp.lt.s32.totalorder %s721_s12, %s721_s12 }
 0x27f   : > { %p723_p11 = pnand %p722_p10, %p953_p4  ;;  %p730_p0 = por %p729_p13, %p728_p12 }
 0x281   : > { %p724_p7 = pneg %p723_p11 }
 0x283   : > { %p731_p2 = pnand %p730_p0, %p724_p7 }
 0x285   : > { %734 = shalt.err (!%p731_p2)
}
 0x286   : > { %s813_s22 = smov 128   ;;  %s814_s18 = smov 8  }
 0x287   : > { %590 = dma.vmem_to_hbm [thread:$0]  (%p953_p4), %s485_s11, 256, %s989_s3, [#allocation6], %s813_s22, %s813_s22, %s814_s18  }
 0x288   : > { %778 = dma.done.wait (%p953_p4), [#allocation6], 256  }
 0x289   : > { %780 = vsyncadd (%p953_p4), [#allocation6], 4294967040 }
 0x28a PF: > { %s18_s17 = sadd.s32 1, %s803_s17   ;;  %s996_s12 = smov %s787_s13 }
 0x28b   : > { %p15_p3 = scmp.ge.s32.totalorder %s18_s17, 4   ;;  %s997_s13 = smov %s791_s14 }
 0x28c   : > { %s998_s14 = smov %s911_s9  ;;  %s999_s15 = smov %s799_s16 }
 0x28d   : > { %s1000_s16 = smov %s1002_s25  ;;  %17 = sbr.rel (!%p15_p3) target bundleno = 6 (0x6), region = 83 }
 0x292   :  { %500 = vsyncpa [#allocation5], 1 }
 0x293   :  { %502 = vsyncpa [#allocation5 + $0x1], 1 }
 0x294   :  { %503 = vsyncpa [#allocation8], 1 }
 0x295   :  { %504 = vsyncpa [#allocation6], 1 }
 0x296   :  { %506 = vsyncpa [#allocation6 + $0x1], 1 }

// kernel: tpu_custom_call.1
= control target key start
LH: loop header
LB: loop body
LE: loop exit
PB: predicated region body
PF: predicated region fallthrough
CT: control target
= control target key end

     0   :  { %8 = vsyncpa [#allocation5], 0  ;;  %s986_s0 = inlined_call_operand.hbm [shape: f32[2,4,256], index: 0, kind: input, shape index: {}]   ;;  %s987_s1 = inlined_call_operand.hbm [shape: bf16[256,256], index: 1, kind: input, shape index: {}]   ;;  %s988_s2 = inlined_call_operand.vmem [shape: f32[1,256], index: 2, kind: input, shape index: {}]   ;;  %s989_s3 = inlined_call_operand.hbm [shape: f32[2,4,256], index: 3, kind: output, shape index: {}]  }
   0x1   :  { %10 = vsyncpa [#allocation5 + $0x1], 0 }
   0x2   :  { %11 = vsyncpa [#allocation8], 0 }
   0x3   :  { %12 = vsyncpa [#allocation6], 0  ;;  %s835_s12 = smov 0   ;;  %s837_s13 = smov 0  }
   0x4   :  { %s839_s14 = smov 0   ;;  %s841_s15 = smov 0  }
   0x5   :  { %s843_s16 = smov 0   ;;  %s845_s17 = smov 0  }
   0x6 LB: > { %s563_s18 = sadd.s32 4294967295, %s803_s17   ;;  %p52_p0 = scmp.ne.s32.totalorder %s787_s13, %s783_s12  ;;  %s803_s17 = sphi %s845_s17, %s18_s17   ;;  %s799_s16 = sphi %s843_s16, %s1000_s16   ;;  %s795_s15 = sphi %s841_s15, %s999_s15   ;;  %s791_s14 = sphi %s839_s14, %s998_s14   ;;  %s787_s13 = sphi %s837_s13, %s997_s13   ;;  %s783_s12 = sphi %s835_s12, %s996_s12  }
   0x7   : > { %p867_p1 = scmp.eq.s32.totalorder %s563_s18, 0  ;;  %p564_p2 = scmp.ge.s32.totalorder %s803_s17, 1 }
   0x8   : > { %p131_p3 = scmp.lt.s32.totalorder %s803_s17, 3  ;;  %s805_s22 = smov [#allocation7]  }
   0x9   : > { %p875_p4 = por %p867_p1, %p52_p0  ;;  %s143_s23 = sshll.u32 %s805_s22, 4  ;;  %s144_s23 = int_to_ptr.vmem [resolvable:$true] %s143_s23 }
   0xa   : > { %p879_p5 = pnand %p564_p2, %p131_p3  ;;  %s27_s25 = sadd.s32 1, %s799_s16 }
   0xb   : > { %s678_s26 = scalar_lea.vmem %s144_s23, 4096  ;;  %p686_p12 = scmp.lt.s32.totalorder %s144_s23, %s144_s23 }
   0xc   : > { %p593_p6 = pneg %p879_p5  ;;  %p679_p9 = scmp.ne.s32.totalorder %s144_s23, %s678_s26 }
   0xd   : > { %p687_p13 = scmp.lt.s32.totalorder %s678_s26, %s678_s26 }
   0xe   : > { %p887_p7 = pnand %p593_p6, %p867_p1 }
   0xf   : > { %p688_p0 = por %p687_p13, %p686_p12 }
  0x10   : > { %p669_p8 = pneg %p887_p7 }
  0x12   : > { %p681_p10 = pnand %p679_p9, %p669_p8 }
  0x14   : > { %p682_p11 = pneg %p681_p10 }
  0x16   : > { %p689_p2 = pnand %p688_p0, %p682_p11 }
  0x18   : > { %692 = shalt.err (!%p689_p2)
}
  0x19   : > { %s806_s27 = smov 128   ;;  %s807_s28 = smov 8  }
  0x1a   : > { %596 = dma.hbm_to_vmem [thread:$0]  (!%p887_p7), %s987_s1, 4096, %s144_s23, [#allocation8], %s806_s27, %s806_s27, %s807_s28  }
  0x1b   : > { %p28_p3 = scmp.ge.s32.totalorder %s27_s25, 2  ;;  %s39_s4 = sadd.s32 1, %s791_s14 }
  0x1c   : > { %p46_p6 = scmp.ne.s32.totalorder %s791_s14, %s787_s13  ;;  %p47_p8 = scmp.eq.s32.totalorder %s803_s17, 0 }
  0x1d   : > { %s1002_s25 = smov (%p28_p3, %s27_s25), 0  ;;  %p602_p10 = scmp.lt.s32.totalorder %s803_s17, 2 }
  0x1e   : > { %p48_p9 = por %p47_p8, %p46_p6  ;;  %s34_s5 = ssub.s32 %s799_s16, %s1002_s25 }
  0x1f   : > { %s160_s6 = sand.u32 1, %s791_s14   ;;  %p37_p11 = scmp.eq.s32.totalorder %s34_s5, 0 }
  0x20   : > { %s567_s7 = sshll.u32 %s160_s6, 3  ;;  %s581_s8 = sshll.u32 %s799_s16, 7 }
  0x21   : > { %s911_s9 = scalar_select %p37_p11, %s791_s14, %s39_s4  }
  0x22   : > { %s172_s12 = scalar_lea.hbm %s986_s0, %s581_s8  ;;  %s164_s22 = scalar_lea.vmem [#allocation4], %s567_s7 }
  0x23   : > { %s174_s23 = sshll.u32 %s164_s22, 4  ;;  %p916_p7 = pnand %p602_p10, %p48_p9  ;;  %s175_s23 = int_to_ptr.vmem [resolvable:$true] %s174_s23 }
  0x24   : > { %s161_s26 = scalar_lea.sflag [#allocation5], %s160_s6  ;;  %s706_s27 = scalar_lea.vmem %s175_s23, 128 }
  0x25   : > { %p695_p12 = pneg %p916_p7  ;;  %p707_p13 = scmp.ne.s32.totalorder %s175_s23, %s706_s27 }
  0x26   : > { %s808_s28 = smov [#allocation4]  }
  0x27   : > { %p709_p0 = pnand %p707_p13, %p695_p12  ;;  %s711_s29 = sshll.u32 %s808_s28, 4  ;;  %s712_s29 = int_to_ptr.vmem [resolvable:$false] %s711_s29 }
  0x28   : > { %s713_s30 = scalar_lea.vmem %s712_s29, 256  ;;  %p714_p3 = scmp.lt.s32.totalorder %s175_s23, %s712_s29 }
  0x29   : > { %p710_p2 = pneg %p709_p0  ;;  %p715_p6 = scmp.lt.s32.totalorder %s713_s30, %s706_s27 }
  0x2b   : > { %p716_p8 = por %p715_p6, %p714_p3 }
  0x2d   : > { %p717_p9 = pnand %p716_p8, %p710_p2 }
  0x2f   : > { %720 = shalt.err (!%p717_p9)
}
  0x30   : > { %600 = dma.hbm_to_vmem [thread:$0]  (!%p916_p7), %s172_s12, 128, %s175_s23, %s161_s26  }
  0x31   : > { %183 = sbr.rel (%p879_p5) target bundleno = 650 (0x28a), region = 32  ;;  %s185_s4 = sand.u32 (!%p879_p5), 1, %s787_s13  }
  0x32   : > { %s927_s5 = sshll.u32 (!%p879_p5), %s185_s4, 3  ;;  %s186_s6 = scalar_lea.sflag (!%p879_p5), [#allocation5], %s185_s4 }
  0x33   : > { %s189_s7 = scalar_lea.vmem (!%p879_p5), [#allocation4], %s927_s5 }
  0x36   : > { %770 = dma.done.wait (%p875_p4), %s186_s6, 128  }
  0x37   : > { %772 = vsyncadd (%p875_p4), %s186_s6, 4294967168 }
  0x38   : > { %774 = dma.done.wait (%p867_p1), [#allocation8], 4096  }
  0x39   : > { %776 = vsyncadd (%p867_p1), [#allocation8], 4294963200  ;;  %p573_p5 = scmp.ne.s32.totalorder %s795_s15, 0 }
  0x3b   : > { %214 = sbr.rel (%p573_p5) target bundleno = 66 (0x42), region = 44 }
  0x40   : > { %vm215_vm0 = vcmask 3072   ;;  %v809_v0 = vmov 0.0  }
  0x41   : > { %216 = vst.msk [vmem:[#allocation2] sm:$0xf] %vm215_vm0, %v809_v0  ;;  %217 = vst.msk [vmem:[#allocation3] sm:$0xf] %vm215_vm0, %v809_v0 }
  0x42 PF: > { %v233_v1 = vld [vmem:[#allocation7 + $0x78] sm:$0xff]  ;;  %v232_v2 = vld [vmem:[#allocation7 + $0x70] sm:$0xff]  ;;  %v231_v3 = vld [vmem:[#allocation7 + $0x68] sm:$0xff]  ;;  %s582_s21 = sshll.u32 %s795_s15, 3  ;;  %vm412_vm1 = vcmask 1043456   ;;  %vm419_vm2 = vcmask 3072  }
  0x43   : > { %v281_v4 = vunpack.c.h.bf16 %v233_v1  ;;  %v280_v5 = vunpack.c.l.bf16 %v233_v1  ;;  %v279_v6 = vunpack.c.h.bf16 %v232_v2  ;;  %v278_v7 = vunpack.c.l.bf16 %v232_v2  ;;  %v230_v8 = vld [vmem:[#allocation7 + $0x60] sm:$0xff]  ;;  %v229_v11 = vld [vmem:[#allocation7 + $0x58] sm:$0xff]  ;;  %v228_v14 = vld [vmem:[#allocation7 + $0x50] sm:$0xff]  ;;  %s409_s8 = scalar_lea.vmem [#allocation9], %s582_s21  ;;  %p576_p1 = scmp.ne.s32.totalorder %s795_s15, 1 }
  0x44   : > { %v277_v9 = vunpack.c.h.bf16 %v231_v3  ;;  %v276_v10 = vunpack.c.l.bf16 %v231_v3  ;;  %v275_v12 = vunpack.c.h.bf16 %v230_v8  ;;  %v274_v13 = vunpack.c.l.bf16 %v230_v8  ;;  %v227_v17 = vld [vmem:[#allocation7 + $0x48] sm:$0xff]  ;;  %v226_v20 = vld [vmem:[#allocation7 + $0x40] sm:$0xff]  ;;  %v225_v23 = vld [vmem:[#allocation7 + $0x38] sm:$0xff] }
  0x45   : > { %318 = vmatprep.subr.mxu0 %v281_v4  ;;  %v273_v15 = vunpack.c.h.bf16 %v229_v11  ;;  %v272_v16 = vunpack.c.l.bf16 %v229_v11  ;;  %v271_v18 = vunpack.c.h.bf16 %v228_v14  ;;  %v270_v19 = vunpack.c.l.bf16 %v228_v14  ;;  %v224_v26 = vld [vmem:[#allocation7 + $0x30] sm:$0xff]  ;;  %v223_v30 = vld [vmem:[#allocation7 + $0x28] sm:$0xff]  ;;  %v222_v34 = vld [vmem:[#allocation7 + $0x20] sm:$0xff] }
  0x46   : > { %319 = vmatpush1.msra.mxu0 %v280_v5  ;;  %v269_v21 = vunpack.c.h.bf16 %v227_v17  ;;  %v268_v22 = vunpack.c.l.bf16 %v227_v17  ;;  %v267_v24 = vunpack.c.h.bf16 %v226_v20  ;;  %v266_v25 = vunpack.c.l.bf16 %v226_v20  ;;  %v941_v27 = vld [vmem:[%s189_s7] sm:$0xff]  ;;  %v219_v43 = vld [vmem:[#allocation7 + $0x8] sm:$0xff]  ;;  %v218_v46 = vld [vmem:[#allocation7] sm:$0xff] }
  0x47   : > { %320 = vmatprep.subr.mxu0 %v279_v6  ;;  %v265_v28 = vunpack.c.h.bf16 %v225_v23  ;;  %v264_v29 = vunpack.c.l.bf16 %v225_v23  ;;  %v263_v31 = vunpack.c.h.bf16 %v224_v26  ;;  %v316_v32 = vcombine.high %v941_v27, %v941_v27  ;;  %v221_v37 = vld [vmem:[#allocation7 + $0x18] sm:$0xff]  ;;  %v220_v40 = vld [vmem:[#allocation7 + $0x10] sm:$0xff]  ;;  %v247_v55 = vld [vmem:[#allocation7 + $0xe8] sm:$0xff] }
  0x48   : > { %321 = vmatpush1.msra.mxu0 %v278_v7  ;;  %v262_v33 = vunpack.c.l.bf16 %v224_v26  ;;  %v261_v35 = vunpack.c.h.bf16 %v223_v30  ;;  %v260_v36 = vunpack.c.l.bf16 %v223_v30  ;;  %v259_v38 = vunpack.c.h.bf16 %v222_v34  ;;  %v249_v49 = vld [vmem:[#allocation7 + $0xf8] sm:$0xff]  ;;  %v248_v52 = vld [vmem:[#allocation7 + $0xf0] sm:$0xff]  ;;  %v246_v58 = vld [vmem:[#allocation7 + $0xe0] sm:$0xff] }
  0x49   : > { %322 = vmatprep.subr.mxu0 %v277_v9  ;;  %382 = vmatprep.mubr.f32.mxu0 %v316_v32  ;;  %v258_v39 = vunpack.c.l.bf16 %v222_v34  ;;  %v257_v41 = vunpack.c.h.bf16 %v221_v37  ;;  %v256_v42 = vunpack.c.l.bf16 %v221_v37  ;;  %v255_v44 = vunpack.c.h.bf16 %v220_v40  ;;  %v245_v61 = vld [vmem:[#allocation7 + $0xd8] sm:$0xff]  ;;  %v244_v0 = vld [vmem:[#allocation7 + $0xd0] sm:$0xff]  ;;  %v243_v3 = vld [vmem:[#allocation7 + $0xc8] sm:$0xff] }
  0x4a   : > { %323 = vmatpush1.msra.mxu0 %v276_v10  ;;  %v254_v45 = vunpack.c.l.bf16 %v220_v40  ;;  %v253_v47 = vunpack.c.h.bf16 %v219_v43  ;;  %v252_v48 = vunpack.c.l.bf16 %v219_v43  ;;  %v251_v50 = vunpack.c.h.bf16 %v218_v46  ;;  %v242_v6 = vld [vmem:[#allocation7 + $0xc0] sm:$0xff]  ;;  %v241_v9 = vld [vmem:[#allocation7 + $0xb8] sm:$0xff] }
  0x4b   : > { %324 = vmatprep.subr.mxu0 %v275_v12  ;;  %v250_v51 = vunpack.c.l.bf16 %v218_v46  ;;  %v313_v53 = vunpack.c.h.bf16 %v249_v49  ;;  %v312_v54 = vunpack.c.l.bf16 %v249_v49  ;;  %v311_v56 = vunpack.c.h.bf16 %v248_v52  ;;  %v240_v12 = vld [vmem:[#allocation7 + $0xb0] sm:$0xff] }
  0x4c   : > { %325 = vmatpush1.msra.mxu0 %v274_v13  ;;  %v310_v57 = vunpack.c.l.bf16 %v248_v52  ;;  %v309_v59 = vunpack.c.h.bf16 %v247_v55  ;;  %v308_v60 = vunpack.c.l.bf16 %v247_v55  ;;  %v307_v62 = vunpack.c.h.bf16 %v246_v58  ;;  %v411_v55 = vld [vmem:[#allocation2] sm:$0xf] }
  0x4d   : > { %326 = vmatprep.subr.mxu0 %v273_v15  ;;  %v306_v63 = vunpack.c.l.bf16 %v246_v58  ;;  %v305_v1 = vunpack.c.h.bf16 %v245_v61  ;;  %v304_v2 = vunpack.c.l.bf16 %v245_v61  ;;  %v303_v4 = vunpack.c.h.bf16 %v244_v0  ;;  %v239_v15 = vld [vmem:[#allocation7 + $0xa8] sm:$0xff] }
  0x4e   : > { %327 = vmatpush1.msra.mxu0 %v272_v16  ;;  %v302_v5 = vunpack.c.l.bf16 %v244_v0  ;;  %v301_v7 = vunpack.c.h.bf16 %v243_v3  ;;  %v300_v8 = vunpack.c.l.bf16 %v243_v3  ;;  %v299_v10 = vunpack.c.h.bf16 %v242_v6  ;;  %v421_v58 = vld [vmem:[#allocation3] sm:$0xf] }
  0x4f   : > { %328 = vmatprep.subr.mxu0 %v271_v18  ;;  %v298_v11 = vunpack.c.l.bf16 %v242_v6  ;;  %v297_v13 = vunpack.c.h.bf16 %v241_v9  ;;  %v296_v14 = vunpack.c.l.bf16 %v241_v9  ;;  %v295_v16 = vunpack.c.h.bf16 %v240_v12  ;;  %v238_v18 = vld [vmem:[#allocation7 + $0xa0] sm:$0xff] }
  0x50   : > { %329 = vmatpush1.msra.mxu0 %v270_v19  ;;  %v294_v17 = vunpack.c.l.bf16 %v240_v12  ;;  %v293_v19 = vunpack.c.h.bf16 %v239_v15  ;;  %v292_v20 = vunpack.c.l.bf16 %v239_v15  ;;  %v290_v23 = vunpack.c.l.bf16 %v238_v18 }
  0x51   : > { %330 = vmatprep.subr.mxu0 %v269_v21  ;;  %v237_v21 = vld [vmem:[#allocation7 + $0x98] sm:$0xff] }
  0x52   : > { %331 = vmatpush1.msra.mxu0 %v268_v22  ;;  %v291_v22 = vunpack.c.h.bf16 %v238_v18  ;;  %v288_v26 = vunpack.c.l.bf16 %v237_v21 }
  0x53   : > { %332 = vmatprep.subr.mxu0 %v267_v24  ;;  %v236_v24 = vld [vmem:[#allocation7 + $0x90] sm:$0xff] }
  0x54   : > { %333 = vmatpush1.msra.mxu0 %v266_v25  ;;  %v289_v25 = vunpack.c.h.bf16 %v237_v21  ;;  %v286_v30 = vunpack.c.l.bf16 %v236_v24 }
  0x55   : > { %334 = vmatprep.subr.mxu0 %v265_v28  ;;  %v235_v28 = vld [vmem:[#allocation7 + $0x88] sm:$0xff] }
  0x56   : > { %335 = vmatpush1.msra.mxu0 %v264_v29  ;;  %v287_v29 = vunpack.c.h.bf16 %v236_v24  ;;  %v285_v32 = vunpack.c.h.bf16 %v235_v28 }
  0x57   : > { %336 = vmatprep.subr.mxu0 %v263_v31  ;;  %v234_v31 = vld [vmem:[#allocation7 + $0x80] sm:$0xff] }
  0x58   : > { %337 = vmatpush1.msra.mxu0 %v262_v33  ;;  %v284_v33 = vunpack.c.l.bf16 %v235_v28  ;;  %v283_v34 = vunpack.c.h.bf16 %v234_v31 }
  0x59   : > { %338 = vmatprep.subr.mxu0 %v261_v35  ;;  %v282_v35 = vunpack.c.l.bf16 %v234_v31 }
  0x5a   : > { %339 = vmatpush1.msra.mxu0 %v260_v36  ;;  %v391_v36 = vlaneseq }
  0x5b   : > { %340 = vmatprep.subr.mxu0 %v259_v38 }
  0x5c   : > { %341 = vmatpush1.msra.mxu0 %v258_v39  ;;  %v392_v37 = vshrl.u32 %v391_v36, 7  ;;  %v389_v39 = vld [vmem:[%s988_s2] sm:$0x3] }
  0x5d   : > { %342 = vmatprep.subr.mxu0 %v257_v41 }
  0x5e   : > { %343 = vmatpush1.msra.mxu0 %v256_v42  ;;  %v393_v38 = vsub.s32 0, %v392_v37  ;;  %v397_v40 = vsub.s32 1, %v392_v37 }
  0x5f   : > { %344 = vmatprep.subr.mxu0 %v255_v44 }
  0x60   : > { %345 = vmatpush1.msra.mxu0 %v254_v45  ;;  %v394_v41 = vrot.slane %v389_v39, %v393_v38  ;;  %v398_v42 = vrot.slane %v389_v39, %v397_v40 }
  0x61   : > { %346 = vmatprep.subr.mxu0 %v253_v47 }
  0x62   : > { %347 = vmatpush1.msra.mxu0 %v252_v48 }
  0x63   : > { %348 = vmatprep.subr.mxu0 %v251_v50 }
  0x64   : > { %349 = vmatpush1.msra.mxu0 %v250_v51 }
  0x65   : > { %350 = vmatprep.subr.mxu0 %v313_v53 }
  0x66   : > { %351 = vmatpush2.msra.mxu0 %v312_v54 }
  0x67   : > { %352 = vmatprep.subr.mxu0 %v311_v56 }
  0x68   : > { %353 = vmatpush2.msra.mxu0 %v310_v57 }
  0x69   : > { %354 = vmatprep.subr.mxu0 %v309_v59 }
  0x6a   : > { %355 = vmatpush2.msra.mxu0 %v308_v60 }
  0x6b   : > { %356 = vmatprep.subr.mxu0 %v307_v62 }
  0x6c   : > { %357 = vmatpush2.msra.mxu0 %v306_v63 }
  0x6d   : > { %358 = vmatprep.subr.mxu0 %v305_v1 }
  0x6e   : > { %359 = vmatpush2.msra.mxu0 %v304_v2 }
  0x6f   : > { %360 = vmatprep.subr.mxu0 %v303_v4 }
  0x70   : > { %361 = vmatpush2.msra.mxu0 %v302_v5 }
  0x71   : > { %362 = vmatprep.subr.mxu0 %v301_v7 }
  0x72   : > { %363 = vmatpush2.msra.mxu0 %v300_v8 }
  0x73   : > { %364 = vmatprep.subr.mxu0 %v299_v10 }
  0x74   : > { %365 = vmatpush2.msra.mxu0 %v298_v11 }
  0x75   : > { %366 = vmatprep.subr.mxu0 %v297_v13 }
  0x76   : > { %367 = vmatpush2.msra.mxu0 %v296_v14 }
  0x77   : > { %368 = vmatprep.subr.mxu0 %v295_v16 }
  0x78   : > { %369 = vmatpush2.msra.mxu0 %v294_v17 }
  0x79   : > { %370 = vmatprep.subr.mxu0 %v293_v19 }
  0x7a   : > { %371 = vmatpush2.msra.mxu0 %v292_v20 }
  0x7b   : > { %372 = vmatprep.subr.mxu0 %v291_v22 }
  0x7c   : > { %373 = vmatpush2.msra.mxu0 %v290_v23 }
  0x7d   : > { %374 = vmatprep.subr.mxu0 %v289_v25 }
  0x7e   : > { %375 = vmatpush2.msra.mxu0 %v288_v26 }
  0x7f   : > { %376 = vmatprep.subr.mxu0 %v287_v29 }
  0x80   : > { %377 = vmatpush2.msra.mxu0 %v286_v30 }
  0x81   : > { %378 = vmatprep.subr.mxu0 %v285_v32 }
  0x82   : > { %379 = vmatpush2.msra.mxu0 %v284_v33 }
  0x83   : > { %380 = vmatprep.subr.mxu0 %v283_v34 }
  0x84   : > { %381 = vmatpush2.msra.mxu0 %v282_v35 }
  0x85   : > { %383 = vmatmul.mubr.f32.vlgmr.msra.gmra.mxu0 %v941_v27 }
 0x145   : > { %v384_v43 = vpop.f32.mrf.mxu0 }
 0x146   : > { %v401_v44 = vmul.f32 %v394_v41, %v384_v43 }
 0x147   : > { %v386_v45 = vpop.f32.mrf.mxu0 }
 0x148   : > { %v402_v46 = vmul.f32 %v398_v42, %v386_v45  ;;  %v413_v47 = vsel %vm412_vm1, %v401_v44, 0.0  ;;  %v422_v27 = vmul.f32 %v401_v44, %v401_v44 }
 0x14a   : > { %v405_v48 = vcombine.low %v401_v44, %v402_v46  ;;  %v414_v49 = vsel %vm412_vm1, %v402_v46, 0.0  ;;  %v423_v50 = vmul.f32 %v402_v46, %v402_v46  ;;  %v424_v53 = vsel %vm412_vm1, %v422_v27, 0.0 }
 0x14b   : > { %v415_v51 = vadd.f32 %v414_v49, %v413_v47 }
 0x14c   : > { %410 = vst [vmem:[%s409_s8] sm:$0xff] %v405_v48  ;;  %v425_v52 = vsel %vm412_vm1, %v423_v50, 0.0 }
 0x14d   : > { %416 = vadd.xlane.f32.xlu0 %v415_v51  ;;  %v426_v54 = vadd.f32 %v425_v52, %v424_v53 }
 0x151   : > { %427 = vadd.xlane.f32.xlu0 %v426_v54 }
 0x1d6   : > { %v417_v56 = vpop.xlane.xlu0 %416 }
 0x1d7   : > { %v418_v57 = vadd.f32 %v417_v56, %v411_v55 }
 0x1d9   : > { %420 = vst.msk [vmem:[#allocation2] sm:$0xf] %vm419_vm2, %v418_v57  ;;  %434 = sbr.rel (%p576_p1) target bundleno = 634 (0x27a), region = 48 }
 0x1da   : > { %v428_v59 = vpop.xlane.xlu0 %427 }
 0x1db   : > { %v429_v60 = vadd.f32 %v428_v59, %v421_v58 }
 0x1dd   : > { %430 = vst.msk [vmem:[#allocation3] sm:$0xf] %vm419_vm2, %v429_v60 }
 0x1de   : > { %v810_v63 = vmov 0   ;;  %v811_v6 = vmov 839922192   ;;  %v443_v12 = vld [vmem:[#allocation9] sm:$0xff]  ;;  %v444_v13 = vld [vmem:[#allocation9 + $0x8] sm:$0xff] }
 0x1df   : > { %664 = vset.pattern.permute.xlu0 %v810_v63  ;;  %v450_v7 = vunpack.c.l.s4 %v811_v6 }
 0x1e0   : > { %v435_v61 = vld [vmem:[#allocation2] sm:$0xf] }
 0x1e1   : > { %v436_v0 = vmul.f32 0.001953125, %v435_v61  ;;  %v451_v8 = vunpack.c.0.s8 %v450_v7 }
 0x1e3   : > { %447 = vperm.xlu0 %664, %v436_v0   ;;  %v439_v2 = vmul.f32 %v436_v0, %v436_v0  ;;  %v454_v9 = vsub.s32 %v451_v8, %v392_v37 }
 0x1e4   : > { %v437_v62 = vld [vmem:[#allocation3] sm:$0xf] }
 0x1e5   : > { %v438_v1 = vmul.f32 0.001953125, %v437_v62 }
 0x1e7   : > { %v440_v3 = vsub.f32 %v438_v1, %v439_v2 }
 0x1e9   : > { %v441_v4 = vadd.f32 1e-05, %v440_v3 }
 0x1eb   : > { %665 = vrsqrt.f32 %v441_v4 }
 0x1f8   : > { %v666_v5 = vpop.eup %665 }
 0x1f9   : > { %461 = vperm.xlu0 %664, %v666_v5  }
 0x25e   : > { %v448_v10 = vpop.permute.xlu0 %447 }
 0x25f   : > { %v455_v11 = vrot.slane %v448_v10, %v454_v9 }
 0x261   : > { %v457_v15 = vsub.f32 %v443_v12, %v455_v11  ;;  %v458_v16 = vsub.f32 %v444_v13, %v455_v11 }
 0x274   : > { %v462_v14 = vpop.permute.xlu0 %461 }
 0x275   : > { %v469_v17 = vrot.slane %v462_v14, %v454_v9 }
 0x277   : > { %v471_v18 = vmul.f32 %v469_v17, %v457_v15  ;;  %v472_v19 = vmul.f32 %v469_v17, %v458_v16 }
 0x279   : > { %473 = vst [vmem:[#allocation9] sm:$0xff] %v471_v18  ;;  %474 = vst [vmem:[#allocation9 + $0x8] sm:$0xff] %v472_v19 }
 0x27a PF: > { %p953_p4 = scmp.eq.s32.totalorder %s563_s18, 1  ;;  %s812_s10 = smov [#allocation9]  }
 0x27b   : > { %s484_s11 = sshll.u32 %s812_s10, 4  ;;  %s485_s11 = int_to_ptr.vmem [resolvable:$true] %s484_s11 }
 0x27c   : > { %s721_s12 = scalar_lea.vmem %s485_s11, 256  ;;  %p728_p12 = scmp.lt.s32.totalorder %s485_s11, %s485_s11 }
 0x27d   : > { %p722_p10 = scmp.ne.s32.totalorder %s485_s11, %s721_s12  ;;  %p729_p13 = scmp.lt.s32.totalorder %s721_s12, %s721_s12 }
 0x27f   : > { %p723_p11 = pnand %p722_p10, %p953_p4  ;;  %p730_p0 = por %p729_p13, %p728_p12 }
 0x281   : > { %p724_p7 = pneg %p723_p11 }
 0x283   : > { %p731_p2 = pnand %p730_p0, %p724_p7 }
 0x285   : > { %734 = shalt.err (!%p731_p2)
}
 0x286   : > { %s813_s22 = smov 128   ;;  %s814_s18 = smov 8  }
 0x287   : > { %590 = dma.vmem_to_hbm [thread:$0]  (%p953_p4), %s485_s11, 256, %s989_s3, [#allocation6], %s813_s22, %s813_s22, %s814_s18  }
 0x288   : > { %778 = dma.done.wait (%p953_p4), [#allocation6], 256  }
 0x289   : > { %780 = vsyncadd (%p953_p4), [#allocation6], 4294967040 }
 0x28a PF: > { %s18_s17 = sadd.s32 1, %s803_s17   ;;  %s996_s12 = smov %s787_s13 }
 0x28b   : > { %p15_p3 = scmp.ge.s32.totalorder %s18_s17, 4   ;;  %s997_s13 = smov %s791_s14 }
 0x28c   : > { %s998_s14 = smov %s911_s9  ;;  %s999_s15 = smov %s799_s16 }
 0x28d   : > { %s1000_s16 = smov %s1002_s25  ;;  %17 = sbr.rel (!%p15_p3) target bundleno = 6 (0x6), region = 83 }
 0x292   :  { %500 = vsyncpa [#allocation5], 1 }
 0x293   :  { %502 = vsyncpa [#allocation5 + $0x1], 1 }
 0x294   :  { %503 = vsyncpa [#allocation8], 1 }
 0x295   :  { %504 = vsyncpa [#allocation6], 1 }
 0x296   :  { %506 = vsyncpa [#allocation6 + $0x1], 1 }

</bundles_post_ra>
